<compile_context>
chip_gen: v5e
topology: v5e:2x2
jax: 0.10.0
libtpu: 0.0.40
codegen_flags: <defaults>
</compile_context>

<pallas_src>
import functools

import jax
import jax.numpy as jnp
from jax.experimental import pallas as pl
from jax.experimental.pallas import tpu as pltpu

_SUBLANE = 8


def _round_up(n, m):
    return ((n + m - 1) // m) * m


def _mlp_kernel(x_ref, w1_ref, b1_ref, w2_ref, b2_ref, w3_ref, b3_ref,
                fused_ref, *, h2_dim, use_bf16_matmul):
    """One batch tile: fc1+ReLU -> fc2+ReLU -> fc3. Stores [h2 | y] fused."""
    mm_dtype = jnp.bfloat16 if use_bf16_matmul else jnp.float32

    # fc1 + ReLU (f32 accumulation on the MXU; bias add / ReLU in f32 on VPU).
    h1 = jnp.dot(x_ref[...], w1_ref[...],
                 preferred_element_type=jnp.float32) + b1_ref[...]
    h1 = jnp.maximum(h1, 0.0)

    # fc2 + ReLU -> "hidden_layer2" of the PyTorch module.
    h2 = jnp.dot(h1.astype(mm_dtype), w2_ref[...],
                 preferred_element_type=jnp.float32) + b2_ref[...]
    h2 = jnp.maximum(h2, 0.0)

    # fc3 (no activation).
    y = jnp.dot(h2.astype(mm_dtype), w3_ref[...],
                preferred_element_type=jnp.float32) + b3_ref[...]

    # Fused, unpadded output slab: columns [0:h2_dim) = hidden2, rest = output.
    fused_ref[:, :h2_dim] = h2
    fused_ref[:, h2_dim:] = y


def mlp_forward(x, params, *, tile_b=4096, use_bf16_matmul=False):
    """Fused MLP forward pass. Returns (output, hidden_layer2), matching the
    PyTorch module's forward signature."""
    w1, b1, w2, b2, w3, b3 = params
    batch, in_dim = x.shape
    h1_dim = w1.shape[1]
    h2_dim = w2.shape[1]
    out_dim = w3.shape[1]
    fused_dim = h2_dim + out_dim

    # Optional bf16 matmul operands: cast at the pallas_call boundary so the
    # HBM->VMEM DMA bytes are actually halved (not after the f32 DMA).
    if use_bf16_matmul:
        x = x.astype(jnp.bfloat16)
        w1 = w1.astype(jnp.bfloat16)
        w2 = w2.astype(jnp.bfloat16)
        w3 = w3.astype(jnp.bfloat16)

    # ---- Batch tiling -------------------------------------------------------
    # Multiple of the 8-sublane granule; cap so large batches give >= 2 grid
    # steps (lets "parallel" shard the batch across v7x's 2 TensorCores).
    half_batch = _round_up(pl.cdiv(batch, 2), _SUBLANE)
    tile_b = _round_up(max(_SUBLANE, min(tile_b, half_batch)), _SUBLANE)
    padded_batch = _round_up(batch, tile_b)
    if padded_batch != batch:
        x = jnp.pad(x, ((0, padded_batch - batch), (0, 0)))
    grid = (padded_batch // tile_b,)

    out_shape = jax.ShapeDtypeStruct((padded_batch, fused_dim), jnp.float32)

    # x / fused output walk the batch grid; weights & biases are grid-invariant
    # (constant index_map -> stay resident in VMEM, no re-DMA per step).
    const2d = lambda i: (0, 0)
    in_specs = [
        pl.BlockSpec((tile_b, in_dim), lambda i: (i, 0)),
        pl.BlockSpec(w1.shape, const2d),
        pl.BlockSpec(b1.shape, const2d),
        pl.BlockSpec(w2.shape, const2d),
        pl.BlockSpec(b2.shape, const2d),
        pl.BlockSpec(w3.shape, const2d),
        pl.BlockSpec(b3.shape, const2d),
    ]
    out_specs = pl.BlockSpec((tile_b, fused_dim), lambda i: (i, 0))

    flops = 2 * padded_batch * (in_dim * h1_dim + h1_dim * h2_dim
                                + h2_dim * out_dim)
    bytes_accessed = (
        padded_batch * in_dim * x.dtype.itemsize            # x read
        + padded_batch * fused_dim * 4                       # fused write (f32)
        + (in_dim * h1_dim + h1_dim * h2_dim + h2_dim * out_dim)
        * w1.dtype.itemsize                                  # weights
        + (h1_dim + h2_dim + out_dim) * 4                    # biases (f32)
    )

    fused = pl.pallas_call(
        functools.partial(_mlp_kernel, h2_dim=h2_dim,
                          use_bf16_matmul=use_bf16_matmul),
        out_shape=out_shape,
        grid=grid,
        in_specs=in_specs,
        out_specs=out_specs,
        compiler_params=pltpu.CompilerParams(
            dimension_semantics=("parallel",),     # v7x: shard batch over 2 TCs
            vmem_limit_bytes=32 * 1024 * 1024,     # tiles use well under this
        ),
        cost_estimate=pl.CostEstimate(
            flops=flops, transcendentals=0, bytes_accessed=bytes_accessed),
    )(x, w1, b1, w2, b2, w3, b3)

    # Strip batch padding and split the fused slab.
    return fused[:batch, h2_dim:], fused[:batch, :h2_dim]


def init_params(key, input_size, hidden_size1, hidden_size2, output_size):
    """Deterministic init mimicking nn.Linear's U(-1/sqrt(fan_in), 1/sqrt(fan_in)).
    Weights are stored transposed as [in, out]; biases as [1, out]."""
    def linear(k, fan_in, fan_out):
        kw, kb = jax.random.split(k)
        bound = 1.0 / jnp.sqrt(jnp.float32(fan_in))
        w = jax.random.uniform(kw, (fan_in, fan_out), jnp.float32, -bound, bound)
        b = jax.random.uniform(kb, (1, fan_out), jnp.float32, -bound, bound)
        return w, b

    k1, k2, k3 = jax.random.split(key, 3)
    w1, b1 = linear(k1, input_size, hidden_size1)
    w2, b2 = linear(k2, hidden_size1, hidden_size2)
    w3, b3 = linear(k3, hidden_size2, output_size)
    return (w1, b1, w2, b2, w3, b3)


def _ref_forward(x, params):
    w1, b1, w2, b2, w3, b3 = params
    h1 = jnp.maximum(x @ w1 + b1, 0.0)
    h2 = jnp.maximum(h1 @ w2 + b2, 0.0)
    return h1 @ w2 + b2, h2  # placeholder (unused)


if __name__ == "__main__":
    # Small shapes consistent with the module: batch=8, input=16, h1=32, h2=32, out=4
    input_size, hidden_size1, hidden_size2, output_size = 16, 32, 32, 4
    batch = 8

    key = jax.random.PRNGKey(0)
    k_params, k_x = jax.random.split(key)

    params = init_params(k_params, input_size, hidden_size1, hidden_size2,
                         output_size)
    x = jax.random.normal(k_x, (batch, input_size), jnp.float32)

    # f32 path: exact parity with the PyTorch float32 module.
    out, hidden2 = jax.block_until_ready(mlp_forward(x, params))

    # Pure-JAX reference of the same math.
    w1, b1, w2, b2, w3, b3 = params
    h1_ref = jnp.maximum(x @ w1 + b1, 0.0)
    h2_ref = jnp.maximum(h1_ref @ w2 + b2, 0.0)
    out_ref = h2_ref @ w3 + b3
    assert out.shape == (batch, output_size)
    assert hidden2.shape == (batch, hidden_size2)
    assert jnp.allclose(out, out_ref, atol=1e-5), "output mismatch"
    assert jnp.allclose(hidden2, h2_ref, atol=1e-5), "hidden2 mismatch"

    # Also exercise the multi-step grid + batch-padding path (still tiny).
    batch2 = 40
    x2 = jax.random.normal(jax.random.PRNGKey(1), (batch2, input_size),
                           jnp.float32)
    out2, hidden2_2 = jax.block_until_ready(
        mlp_forward(x2, params, tile_b=16))
    h1_r2 = jnp.maximum(x2 @ w1 + b1, 0.0)
    h2_r2 = jnp.maximum(h1_r2 @ w2 + b2, 0.0)
    out_r2 = h2_r2 @ w3 + b3
    assert jnp.allclose(out2, out_r2, atol=1e-5), "multi-tile output mismatch"
    assert jnp.allclose(hidden2_2, h2_r2, atol=1e-5), "multi-tile hidden2 mismatch"

    print("KERNEL_OK")
</pallas_src>

<mosaic_0001>
module attributes {stable_mosaic.version = 11 : i64} {
  func.func @_mlp_kernel(%arg0: i32, %arg1: memref<8x16xf32, #tpu.memory_space<vmem>>, %arg2: memref<16x32xf32, #tpu.memory_space<vmem>>, %arg3: memref<1x32xf32, #tpu.memory_space<vmem>>, %arg4: memref<32x32xf32, #tpu.memory_space<vmem>>, %arg5: memref<1x32xf32, #tpu.memory_space<vmem>>, %arg6: memref<32x4xf32, #tpu.memory_space<vmem>>, %arg7: memref<1x4xf32, #tpu.memory_space<vmem>>, %arg8: memref<8x36xf32, #tpu.memory_space<vmem>>) attributes {dimension_semantics = [#tpu.dimension_semantics<parallel>], iteration_bounds = array<i64: 1>, scalar_prefetch = 0 : i64, scratch_operands = 0 : i64, tpu.core_type = #tpu.core_type<tc>, window_params = [{transform_indices = @transform_0, window_bounds = array<i64: 8, 16>}, {pipeline_mode = #tpu.pipeline_mode<synchronous>, transform_indices = @transform_1, window_bounds = array<i64: 16, 32>}, {pipeline_mode = #tpu.pipeline_mode<synchronous>, transform_indices = @transform_2, window_bounds = array<i64: 1, 32>}, {pipeline_mode = #tpu.pipeline_mode<synchronous>, transform_indices = @transform_3, window_bounds = array<i64: 32, 32>}, {pipeline_mode = #tpu.pipeline_mode<synchronous>, transform_indices = @transform_4, window_bounds = array<i64: 1, 32>}, {pipeline_mode = #tpu.pipeline_mode<synchronous>, transform_indices = @transform_5, window_bounds = array<i64: 32, 4>}, {pipeline_mode = #tpu.pipeline_mode<synchronous>, transform_indices = @transform_6, window_bounds = array<i64: 1, 4>}, {transform_indices = @transform_7, window_bounds = array<i64: 8, 36>}]} {
    %c0 = arith.constant 0 : index
    %c0_0 = arith.constant 0 : index
    %0 = vector.load %arg1[%c0, %c0_0] : memref<8x16xf32, #tpu.memory_space<vmem>>, vector<8x16xf32>
    %c0_1 = arith.constant 0 : index
    %c0_2 = arith.constant 0 : index
    %1 = vector.load %arg2[%c0_1, %c0_2] : memref<16x32xf32, #tpu.memory_space<vmem>>, vector<16x32xf32>
    %cst = arith.constant dense<0.000000e+00> : vector<8x32xf32>
    %2 = tpu.matmul %0, %1, %cst {dimension_numbers = #tpu.dot_dimension_numbers<[1], [0], [0], [1], [0, 0, 1, 1], [], []>} : vector<8x16xf32>, vector<16x32xf32>, vector<8x32xf32> -> vector<8x32xf32>
    %c0_3 = arith.constant 0 : index
    %c0_4 = arith.constant 0 : index
    %3 = vector.load %arg3[%c0_3, %c0_4] : memref<1x32xf32, #tpu.memory_space<vmem>>, vector<1x32xf32>
    %4 = vector.broadcast %3 : vector<1x32xf32> to vector<8x32xf32>
    %5 = arith.addf %2, %4 : vector<8x32xf32>
    %cst_5 = arith.constant 0.000000e+00 : f32
    %6 = vector.broadcast %cst_5 : f32 to vector<8x32xf32>
    %7 = arith.maximumf %5, %6 : vector<8x32xf32>
    %c0_6 = arith.constant 0 : index
    %c0_7 = arith.constant 0 : index
    %8 = vector.load %arg4[%c0_6, %c0_7] : memref<32x32xf32, #tpu.memory_space<vmem>>, vector<32x32xf32>
    %cst_8 = arith.constant dense<0.000000e+00> : vector<8x32xf32>
    %9 = tpu.matmul %7, %8, %cst_8 {dimension_numbers = #tpu.dot_dimension_numbers<[1], [0], [0], [1], [0, 0, 1, 1], [], []>} : vector<8x32xf32>, vector<32x32xf32>, vector<8x32xf32> -> vector<8x32xf32>
    %c0_9 = arith.constant 0 : index
    %c0_10 = arith.constant 0 : index
    %10 = vector.load %arg5[%c0_9, %c0_10] : memref<1x32xf32, #tpu.memory_space<vmem>>, vector<1x32xf32>
    %11 = vector.broadcast %10 : vector<1x32xf32> to vector<8x32xf32>
    %12 = arith.addf %9, %11 : vector<8x32xf32>
    %cst_11 = arith.constant 0.000000e+00 : f32
    %13 = vector.broadcast %cst_11 : f32 to vector<8x32xf32>
    %14 = arith.maximumf %12, %13 : vector<8x32xf32>
    %c0_12 = arith.constant 0 : index
    %c0_13 = arith.constant 0 : index
    %15 = vector.load %arg6[%c0_12, %c0_13] : memref<32x4xf32, #tpu.memory_space<vmem>>, vector<32x4xf32>
    %cst_14 = arith.constant dense<0.000000e+00> : vector<8x4xf32>
    %16 = tpu.matmul %14, %15, %cst_14 {dimension_numbers = #tpu.dot_dimension_numbers<[1], [0], [0], [1], [0, 0, 1, 1], [], []>} : vector<8x32xf32>, vector<32x4xf32>, vector<8x4xf32> -> vector<8x4xf32>
    %c0_15 = arith.constant 0 : index
    %c0_16 = arith.constant 0 : index
    %17 = vector.load %arg7[%c0_15, %c0_16] : memref<1x4xf32, #tpu.memory_space<vmem>>, vector<1x4xf32>
    %18 = vector.broadcast %17 : vector<1x4xf32> to vector<8x4xf32>
    %19 = arith.addf %16, %18 : vector<8x4xf32>
    %c0_17 = arith.constant 0 : index
    %c0_18 = arith.constant 0 : index
    %20 = vector.load %arg8[%c0_17, %c0_18] : memref<8x36xf32, #tpu.memory_space<vmem>>, vector<8x32xf32>
    tpu.vector_store %arg8[%c0_17, %c0_18], %14 {strides = array<i32>} : memref<8x36xf32, #tpu.memory_space<vmem>>, vector<8x32xf32>,
    %c0_19 = arith.constant 0 : index
    %c32 = arith.constant 32 : index
    %21 = vector.load %arg8[%c0_19, %c32] : memref<8x36xf32, #tpu.memory_space<vmem>>, vector<8x4xf32>
    tpu.vector_store %arg8[%c0_19, %c32], %19 {strides = array<i32>} : memref<8x36xf32, #tpu.memory_space<vmem>>, vector<8x4xf32>,
    return
  }
  func.func @transform_0(%arg0: i32) -> (i32, i32) {
    %c0_i32 = arith.constant 0 : i32
    %c0_i32_0 = arith.constant 0 : i32
    return %arg0, %c0_i32 : i32, i32
  }
  func.func @transform_1(%arg0: i32) -> (i32, i32) {
    %c0_i32 = arith.constant 0 : i32
    %c0_i32_0 = arith.constant 0 : i32
    %c0_i32_1 = arith.constant 0 : i32
    return %c0_i32, %c0_i32_0 : i32, i32
  }
  func.func @transform_2(%arg0: i32) -> (i32, i32) {
    %c0_i32 = arith.constant 0 : i32
    %c0_i32_0 = arith.constant 0 : i32
    %c0_i32_1 = arith.constant 0 : i32
    return %c0_i32, %c0_i32_0 : i32, i32
  }
  func.func @transform_3(%arg0: i32) -> (i32, i32) {
    %c0_i32 = arith.constant 0 : i32
    %c0_i32_0 = arith.constant 0 : i32
    %c0_i32_1 = arith.constant 0 : i32
    return %c0_i32, %c0_i32_0 : i32, i32
  }
  func.func @transform_4(%arg0: i32) -> (i32, i32) {
    %c0_i32 = arith.constant 0 : i32
    %c0_i32_0 = arith.constant 0 : i32
    %c0_i32_1 = arith.constant 0 : i32
    return %c0_i32, %c0_i32_0 : i32, i32
  }
  func.func @transform_5(%arg0: i32) -> (i32, i32) {
    %c0_i32 = arith.constant 0 : i32
    %c0_i32_0 = arith.constant 0 : i32
    %c0_i32_1 = arith.constant 0 : i32
    return %c0_i32, %c0_i32_0 : i32, i32
  }
  func.func @transform_6(%arg0: i32) -> (i32, i32) {
    %c0_i32 = arith.constant 0 : i32
    %c0_i32_0 = arith.constant 0 : i32
    %c0_i32_1 = arith.constant 0 : i32
    return %c0_i32, %c0_i32_0 : i32, i32
  }
  func.func @transform_7(%arg0: i32) -> (i32, i32) {
    %c0_i32 = arith.constant 0 : i32
    %c0_i32_0 = arith.constant 0 : i32
    return %arg0, %c0_i32 : i32, i32
  }
}

</mosaic_0001>

<bundles_post_ra>
// kernel: tpu_custom_call.1
= control target key start
LH: loop header
LB: loop body
LE: loop exit
PB: predicated region body
PF: predicated region fallthrough
CT: control target
= control target key end

     0   :  { %12 = vsyncpa [#allocation3], 0  ;;  %s356_s0 = inlined_call_operand.hbm [shape: f32[8,16], index: 0, kind: input, shape index: {}]   ;;  %s357_s1 = inlined_call_operand.hbm [shape: f32[16,32], index: 1, kind: input, shape index: {}]   ;;  %s358_s2 = inlined_call_operand.vmem [shape: f32[1,32], index: 2, kind: input, shape index: {}]   ;;  %s359_s3 = inlined_call_operand.vmem [shape: f32[32,32], index: 3, kind: input, shape index: {}]   ;;  %s360_s4 = inlined_call_operand.vmem [shape: f32[1,32], index: 4, kind: input, shape index: {}]   ;;  %s361_s5 = inlined_call_operand.vmem [shape: f32[32,4], index: 5, kind: input, shape index: {}]   ;;  %s362_s6 = inlined_call_operand.vmem [shape: f32[1,4], index: 6, kind: input, shape index: {}]   ;;  %s363_s7 = inlined_call_operand.hbm [shape: f32[8,36], index: 7, kind: output, shape index: {}]  }
   0x1   :  { %13 = vsyncpa [#allocation6], 0 }
   0x2   :  { %14 = vsyncpa [#allocation4], 0  ;;  %s20_s26 = sshll.u32 %s356_s0, 4  ;;  %s268_s27 = smov [#allocation2]   ;;  %s21_s26 = int_to_ptr.hbm [resolvable:$true] %s20_s26 }
   0x3   :  { %s22_s28 = sshll.u32 %s268_s27, 4  ;;  %s30_s8 = sshll.u32 %s357_s1, 4  ;;  %s23_s28 = int_to_ptr.vmem [resolvable:$true] %s22_s28  ;;  %s31_s8 = int_to_ptr.hbm [resolvable:$true] %s30_s8 }
   0x4   :  { %25 = dma.hbm_to_vmem [thread:$0]  %s21_s26, 128, %s23_s28, [#allocation3]  }
   0x5   :  { %s269_s9 = smov [#allocation5]   ;;  %s270_s11 = smov 128  }
   0x6   :  { %s32_s10 = sshll.u32 %s269_s9, 4  ;;  %s271_s12 = smov 8   ;;  %s33_s10 = int_to_ptr.vmem [resolvable:$true] %s32_s10 }
   0x7   :  { %38 = dma.hbm_to_vmem [thread:$0]  %s31_s8, 256, %s33_s10, [#allocation6], %s270_s11, %s270_s11, %s271_s12  }
   0x8   :  { %262 = dma.done.wait [#allocation3], 128  }
   0x9   :  { %263 = vsyncadd [#allocation3], 4294967168 }
   0xa   :  { %264 = dma.done.wait [#allocation6], 256  }
   0xb   :  { %265 = vsyncadd [#allocation6], 4294967040  ;;  %v59_v0 = vld [vmem:[#allocation5 + $0x8] sm:$0xff]  ;;  %v58_v1 = vld [vmem:[#allocation5] sm:$0xff]  ;;  %vm64_vm0 = vcmask 130048   ;;  %vm97_vm1 = vcmask 261120  }
   0xc   :  { %82 = vmatpush.msra.mxu0 %v59_v0  ;;  %v57_v2 = vld [vmem:[#allocation2] sm:$0xff]  ;;  %v92_v3 = vld [vmem:[%s359_s3 + $0x18] sm:$0xff]  ;;  %v91_v4 = vld [vmem:[%s359_s3 + $0x10] sm:$0xff]  ;;  %s272_s8 = smov 32   ;;  %s273_s9 = smov [#allocation7]   ;;  %vm158_vm2 = vcmask 294144  }
   0xd   :  { %113 = vmatpush.msra.mxu1 %v92_v3  ;;  %v90_v5 = vld [vmem:[%s359_s3 + $0x8] sm:$0xff]  ;;  %v89_v6 = vld [vmem:[%s359_s3] sm:$0xff]  ;;  %v125_v7 = vld [vmem:[%s361_s5 + $0x18] sm:$0xff]  ;;  %s167_s12 = sshll.u32 %s363_s7, 4  ;;  %s168_s12 = int_to_ptr.hbm [resolvable:$true] %s167_s12 }
   0xe   :  { %83 = vmatpush.msra.mxu0 %v58_v1  ;;  %145 = vmatpush.msra.mxu2 %v125_v7  ;;  %v187_v8 = vld [vmem:[%s358_s2] ss:$0 sm:$0xff]  ;;  %v124_v12 = vld [vmem:[%s361_s5 + $0x10] sm:$0xff]  ;;  %v123_v13 = vld [vmem:[%s361_s5 + $0x8] sm:$0xff] }
   0xf   :  { %178 = vmatmul.msk.f32.vlgmr.msra.gmra.mxu0 %vm64_vm0, %v57_v2  ;;  %114 = vmatpush.msra.mxu1 %v91_v4  ;;  %v122_v14 = vld [vmem:[%s361_s5] sm:$0xff]  ;;  %s165_s5 = sshll.u32 %s273_s9, 4  ;;  %s166_s5 = int_to_ptr.vmem [resolvable:$true] %s165_s5 }
  0x10   :  { %146 = vmatpush.msra.mxu2 %v124_v12  ;;  %v188_v15 = vld [vmem:[%s360_s4] ss:$0 sm:$0xff] }
  0x11   :  { %115 = vmatpush.msra.mxu1 %v90_v5  ;;  %v189_v19 = vld [vmem:[%s362_s6] ss:$0 sm:$0xff] }
  0x12   :  { %147 = vmatpush.msra.mxu2 %v123_v13 }
  0x13   :  { %116 = vmatpush.msra.mxu1 %v89_v6 }
  0x14   :  { %148 = vmatpush.msra.mxu2 %v122_v14 }
  0x8c   :  { %v85_v9 = vpop.f32.mrf.mxu0 }
  0x8d   :  { %v86_v10 = vadd.f32 %v187_v8, %v85_v9 }
  0x8f   :  { %v88_v11 = vmax.f32 %v86_v10, 0.0 }
  0x91   :  { %179 = vmatmul.msk.f32.vlgmr.msra.gmra.mxu1 %vm97_vm1, %v88_v11 }
 0x10e   :  { %v118_v16 = vpop.f32.mrf.mxu1 }
 0x10f   :  { %v119_v17 = vadd.f32 %v188_v15, %v118_v16 }
 0x111   :  { %v121_v18 = vmax.f32 %v119_v17, 0.0 }
 0x113   :  { %153 = vst.msk [vmem:[#allocation7] sm:$0xff] %vm97_vm1, %v121_v18  ;;  %180 = vmatmul.msk.f32.vlgmr.msra.gmra.mxu2 %vm97_vm1, %v121_v18 }
 0x196   :  { %v150_v20 = vpop.f32.mrf.mxu2 }
 0x197   :  { %v151_v21 = vadd.f32 %v189_v19, %v150_v20 }
 0x199   :  { %155 = vrot.lane.b32.xlu0 %v151_v21, %s272_s8 }
 0x20b   :  { %v156_v22 = vpop.permute.xlu0 %155 }
 0x20c   :  { %159 = vst.msk [vmem:[#allocation7] sm:$0xff] %vm158_vm2, %v156_v22 }
 0x20d   :  { %170 = dma.vmem_to_hbm [thread:$0]  %s166_s5, 128, %s168_s12, [#allocation4]  }
 0x20e   :  { %266 = dma.done.wait [#allocation4], 128  }
 0x20f   :  { %267 = vsyncadd [#allocation4], 4294967168 }
 0x210   :  { %175 = vsyncpa [#allocation3], 1 }
 0x211   :  { %176 = vsyncpa [#allocation6], 1 }
 0x212   :  { %177 = vsyncpa [#allocation4], 1 }

</bundles_post_ra>
